<compile_context>
chip_gen: v7x
topology: tpu7x:2x2x1
jax: 0.10.0
libtpu: 0.0.40
codegen_flags: <defaults>
</compile_context>

<pallas_src>
import jax
import jax.numpy as jnp
from jax.experimental import pallas as pl
from jax.experimental.pallas import tpu as pltpu


# ------------------------------ kernels -------------------------------------


def _identity_dma_kernel(x_hbm_ref, o_hbm_ref, sem):
    # Whole-array HBM -> HBM copy on the DMA engine; no TensorCore compute.
    cp = pltpu.make_async_copy(x_hbm_ref, o_hbm_ref, sem)
    cp.start()
    cp.wait()


def _identity_copy_kernel(x_ref, o_ref):
    # Straight copy of the current VMEM tile (vld -> vst).
    o_ref[...] = x_ref[...]


# ------------------------------ helpers -------------------------------------


def _cost(nbytes: int) -> pl.CostEstimate:
    # Pure copy: 0 flops, N bytes read + N bytes written.
    return pl.CostEstimate(flops=0, transcendentals=0, bytes_accessed=2 * nbytes)


def _best_lane_width(n: int, cap: int = 8192):
    """Largest multiple-of-128 divisor of n (capped), or None if none exists."""
    best = None
    c = 128
    while c <= cap:
        if n % c == 0:
            best = c
        c += 128
    return best


def _default_block_bytes() -> int:
    """Generation-aware target block size for the VMEM-staged path."""
    try:
        kind = jax.devices()[0].device_kind.lower()
    except Exception:
        return 2 << 20
    if "v7" in kind:
        return 8 << 20   # v7x: 3.2 TB/s -> amortize the ~0.35us/step overhead
    if "v6" in kind:
        return 4 << 20   # v6e: 4 buffers * 4 MiB = 16 MiB < 32 MiB scoped default
    return 2 << 20       # v5e & unknown: stay well under the 16 MiB scoped default


# --------------------------- kernel wrappers --------------------------------


def _identity_dma(x: jax.Array) -> jax.Array:
    """One HBM->HBM async copy; no VMEM staging, no grid."""
    nbytes = x.size * jnp.dtype(x.dtype).itemsize
    return pl.pallas_call(
        _identity_dma_kernel,
        out_shape=jax.ShapeDtypeStruct(x.shape, x.dtype),
        in_specs=[pl.BlockSpec(memory_space=pl.ANY)],
        out_specs=pl.BlockSpec(memory_space=pl.ANY),
        scratch_shapes=[pltpu.SemaphoreType.DMA(())],
        compiler_params=pltpu.CompilerParams(has_side_effects=True),
        cost_estimate=_cost(nbytes),
    )(x)


def _identity_vmem(x: jax.Array, *, donate: bool,
                   target_block_bytes=None) -> jax.Array:
    """Tiled HBM->VMEM->HBM BlockSpec pipeline (supports output aliasing)."""
    n = x.size
    itemsize = jnp.dtype(x.dtype).itemsize

    cols = _best_lane_width(n)
    if cols is None:
        # Ragged size: padding would ~3x the HBM traffic (pad + copy + slice);
        # a direct HBM->HBM DMA handles any shape with no staging at all.
        return _identity_dma(x)
    rows = n // cols

    target = target_block_bytes or _default_block_bytes()
    block_rows = max(1, target // (cols * itemsize))
    if block_rows >= rows:
        # Single-block grid: pipelining buys nothing (and on v7x it would
        # leave one TensorCore idle) -> just do the direct DMA copy.
        return _identity_dma(x)

    # Dtype-aware sublane rounding: 8 rows f32, 16 bf16/f16, 32 int8/fp8.
    sub = max(8, 32 // itemsize)
    block_rows = max(sub, (block_rows // sub) * sub)

    grid = (pl.cdiv(rows, block_rows),)
    buf_bytes = 4 * block_rows * cols * itemsize        # 2 in + 2 out buffers
    vmem_limit = (48 << 20) if buf_bytes > (24 << 20) else None

    x2d = x.reshape(rows, cols)
    out2d = pl.pallas_call(
        _identity_copy_kernel,
        out_shape=jax.ShapeDtypeStruct((rows, cols), x.dtype),
        grid=grid,
        in_specs=[pl.BlockSpec((block_rows, cols), lambda i: (i, 0))],
        out_specs=pl.BlockSpec((block_rows, cols), lambda i: (i, 0)),
        input_output_aliases=({0: 0} if donate else {}),
        compiler_params=pltpu.CompilerParams(
            # Parallel row axis: shards tiles across both TCs on v7x,
            # harmless on single-TC v5e/v6e.
            dimension_semantics=("parallel",),
            vmem_limit_bytes=vmem_limit),
        cost_estimate=_cost(n * itemsize),
    )(x2d)
    return out2d.reshape(x.shape)


# ------------------------------ public API ----------------------------------


def identity(x: jax.Array, *, use_kernel: bool = False, method: str = "dma",
             donate: bool = False, target_block_bytes=None) -> jax.Array:
    """Identity.forward(x) -> x (same shape, dtype, values).

    Default (use_kernel=False): zero-cost bypass — returns x unchanged.  This
    is the fastest possible implementation on every TPU generation; any
    kernel adds 2*N bytes of HBM traffic plus launch overhead.

    use_kernel=True forces a real on-device copy (e.g. to produce a fresh
    buffer or benchmark HBM bandwidth):
      * method="dma"  (default): one HBM->HBM async copy, no VMEM staging.
      * method="vmem": tiled BlockSpec pipeline.  donate=True aliases the
        output onto the kernel's input buffer (input_output_aliases={0: 0});
        note this only saves the output HBM allocation — the pipeline still
        reads and writes N bytes, so it is NOT a free identity.  The only
        truly free path is the default bypass.
    """
    if not use_kernel or x.size == 0 or x.ndim == 0:
        return x
    if method == "vmem":
        return _identity_vmem(x, donate=donate,
                              target_block_bytes=target_block_bytes)
    return _identity_dma(x)


if __name__ == "__main__":
    key = jax.random.PRNGKey(0)
    # Small NCHW input consistent with a conv-style module interface.
    x = jax.random.normal(key, (2, 4, 16, 16), dtype=jnp.float32)

    # Default path: zero-cost bypass (Identity.forward is literally `return x`).
    assert identity(x) is x

    # Opt-in kernel path #1: direct HBM->HBM DMA copy.
    y = jax.block_until_ready(identity(x, use_kernel=True))
    assert y.shape == x.shape and y.dtype == x.dtype
    assert bool(jnp.array_equal(y, x))

    # Opt-in kernel path #2: tiled VMEM pipeline.  A small block-size override
    # forces a multi-block grid so the pipelined path is actually exercised.
    x2 = jax.random.normal(key, (160, 4096), dtype=jnp.float32)
    y2 = jax.block_until_ready(
        identity(x2, use_kernel=True, method="vmem",
                 target_block_bytes=256 * 1024))
    assert y2.shape == x2.shape and y2.dtype == x2.dtype
    assert bool(jnp.array_equal(y2, x2))

    print("KERNEL_OK")
</pallas_src>

<mosaic_0001>
module attributes {stable_mosaic.version = 11 : i64} {
  func.func @_identity_dma_kernel(%arg0: memref<2x4x16x16xf32, #tpu.memory_space<any>>, %arg1: memref<2x4x16x16xf32, #tpu.memory_space<any>>, %arg2: memref<!tpu.dma_semaphore, #tpu.memory_space<semaphore_mem>>) attributes {dimension_semantics = [], scalar_prefetch = 0 : i64, scratch_operands = 1 : i64, tpu.core_type = #tpu.core_type<tc>} {
    tpu.enqueue_dma source(%arg0 : memref<2x4x16x16xf32, #tpu.memory_space<any>>) target(%arg1 : memref<2x4x16x16xf32, #tpu.memory_space<any>>) target_semaphore(%arg2 : memref<!tpu.dma_semaphore, #tpu.memory_space<semaphore_mem>>)
    tpu.wait_dma2 semaphore(%arg2 : memref<!tpu.dma_semaphore, #tpu.memory_space<semaphore_mem>>) src(%arg0 : memref<2x4x16x16xf32, #tpu.memory_space<any>>) dst(%arg1 : memref<2x4x16x16xf32, #tpu.memory_space<any>>)
    return
  }
}

</mosaic_0001>

<bundles_post_ra>
// kernel: tpu_custom_call.1
= control target key start
LH: loop header
LB: loop body
LE: loop exit
PB: predicated region body
PF: predicated region fallthrough
CT: control target
= control target key end

     0   :  { %s36_s6 = smov [#allocation2]   ;;  %s37_s7 = smov [#allocation3]   ;;  %s55_s0 = inlined_call_operand.hbm [shape: f32[2,4,16,16], index: 0, kind: input, shape index: {}]   ;;  %s56_s1 = inlined_call_operand.hbm [shape: f32[2,4,16,16], index: 1, kind: output, shape index: {}]  }
   0x1   :  { %s38_s8 = smov 0  }
   0x2   :  { %18 = dma.general %s55_s0, 2048, %s56_s1, %s36_s6, %s37_s7, [#allocation4], %s38_s8, 0  }
   0x3   :  { %34 = dma.done.wait [#allocation2], 2048 }
   0x4   :  { %35 = vsyncadd [#allocation2], 4294965248 }
   0x5   :  { %24 = vsyncmov [#allocation2] }
   0x8   :  { %s25_s13 = vpop.sfrf %24 }
   0x9   :  { %p30_p0 = scmp.ne.s32.totalorder %s25_s13, 0 }
   0xb   :  { %29 = shalt.err (%p30_p0)  }

</bundles_post_ra>
